<compile_context>
chip_gen: v6e
topology: v6e:2x2x1
jax: 0.10.0
libtpu: 0.0.40
codegen_flags: <defaults>
</compile_context>

<pallas_src>
import jax
import jax.numpy as jnp
from jax.experimental import pallas as pl
from jax.experimental.pallas import tpu as pltpu

EPSILON = 0.002
LANE = 128
SUBLANE = 8
OUT_SIZE = 2          # network's final Linear(hidden, 2)
MAX_TM = 2048         # per-step batch rows; per-step VMEM stays ~O(100 KiB)


def _round_up(x, m):
    return (x + m - 1) // m * m


def _cdiv(a, b):
    return -(-a // b)


def _softplus(x):
    # Matches torch.nn.Softplus(beta=1, threshold=20): x for x > 20,
    # log1p(exp(x)) otherwise (overflow in the untaken branch is masked by where).
    return jnp.where(x > 20.0, x, jnp.log1p(jnp.exp(x)))


def _choose_tile(B):
    """Pick (tm, b_pad): >=2 grid steps when possible (v7x megacore), rows
    capped at MAX_TM, padding waste bounded by one tile."""
    n_steps = max(2, _cdiv(B, MAX_TM))
    tm = _round_up(max(1, _cdiv(B, n_steps)), SUBLANE)
    tm = min(tm, _round_up(max(B, SUBLANE), SUBLANE))
    b_pad = _round_up(B, tm)
    return tm, b_pad


def _make_kernel(input_size, out_size, offs):
    o_w1, o_b1, o_w2, o_b2, o_w3, o_b3 = offs

    def kernel(q_ref, p_ref, o_ref):
        hp = p_ref.shape[1]                      # lane-padded hidden (static)
        x = q_ref[...]                           # (TM, input_size)

        # ---- Layer 1: K == input_size is tiny -> VPU broadcast mul-add. ----
        h1 = p_ref[pl.ds(o_b1, 1), :]            # (1, HP) bias
        for i in range(input_size):              # static unroll
            h1 = h1 + x[:, i:i + 1] * p_ref[pl.ds(o_w1 + i, 1), :]
        h1 = _softplus(h1)                       # (TM, HP)

        # ---- Layer 2: dense (HP, HP) -> single MXU tile. ----
        w2 = p_ref[pl.ds(o_w2, hp), :]           # (HP, HP)
        b2 = p_ref[pl.ds(o_b2, 1), :]            # (1, HP)
        h2 = _softplus(
            jnp.dot(h1, w2, preferred_element_type=jnp.float32) + b2)

        # ---- Layer 3: RAW logits only (softplus + eps applied in wrapper). ----
        w3 = p_ref[pl.ds(o_w3, hp), :]           # (HP, HP), cols >= 2 zero
        b3 = p_ref[pl.ds(o_b3, 1), :]            # (1, HP)
        d = jnp.dot(h2, w3, preferred_element_type=jnp.float32) + b3

        # Compact store: only the 2 useful lanes go to HBM (~64x less writeback).
        o_ref[...] = d[:, :out_size]

    return kernel


def pack_params(params, input_size, hidden_size):
    """Pack (w1,b1,w2,b2,w3,b3) into one lane-padded f32 buffer.

    Weights are stored transposed: (in_features, out_features); biases 1-D.
    Zero padding in the *input rows* of each following layer guarantees that
    padded hidden units (whose softplus output is log(2) != 0) cannot leak.
    Any in-place parameter update must preserve that zero padding.
    """
    w1, b1, w2, b2, w3, b3 = params
    hp = _round_up(max(hidden_size, LANE), LANE)
    in_pad = _round_up(max(input_size, SUBLANE), SUBLANE)

    o_w1 = 0
    o_b1 = o_w1 + in_pad
    o_w2 = o_b1 + SUBLANE
    o_b2 = o_w2 + hp
    o_w3 = o_b2 + SUBLANE
    o_b3 = o_w3 + hp
    p_rows = o_b3 + SUBLANE

    buf = jnp.zeros((p_rows, hp), jnp.float32)
    buf = buf.at[o_w1:o_w1 + input_size, :hidden_size].set(w1)
    buf = buf.at[o_b1, :hidden_size].set(b1)
    buf = buf.at[o_w2:o_w2 + hidden_size, :hidden_size].set(w2)
    buf = buf.at[o_b2, :hidden_size].set(b2)
    buf = buf.at[o_w3:o_w3 + hidden_size, :OUT_SIZE].set(w3)
    buf = buf.at[o_b3, :OUT_SIZE].set(b3)
    return buf, (o_w1, o_b1, o_w2, o_b2, o_w3, o_b3)


def damping_logits(Q, packed, offs, input_size):
    """Q: (B, input_size) -> (B, 2) raw (pre-softplus) layer-3 outputs."""
    Q = Q.astype(jnp.float32)
    B = Q.shape[0]
    p_rows, hp = packed.shape

    tm, b_pad = _choose_tile(B)
    if b_pad != B:
        Q = jnp.pad(Q, ((0, b_pad - B), (0, 0)))

    kernel = _make_kernel(input_size, OUT_SIZE, offs)
    out = pl.pallas_call(
        kernel,
        out_shape=jax.ShapeDtypeStruct((b_pad, OUT_SIZE), jnp.float32),
        grid=(b_pad // tm,),
        in_specs=[
            pl.BlockSpec((tm, input_size), lambda i: (i, 0)),   # streamed q rows
            pl.BlockSpec((p_rows, hp), lambda i: (0, 0)),       # resident params
        ],
        out_specs=pl.BlockSpec((tm, OUT_SIZE), lambda i: (i, 0)),  # compact out
        compiler_params=pltpu.CompilerParams(
            dimension_semantics=("parallel",)),
    )(Q, packed)
    return out[:B]


def damping_diagonals(Q, packed, offs, input_size):
    """Q: (B, input_size) -> (B, 2) positive diagonal entries."""
    # Final softplus + epsilon hoisted out of the kernel: only 2 useful lanes,
    # and this fuses with the slice in XLA.
    return _softplus(damping_logits(Q, packed, offs, input_size)) + EPSILON


def damping_matrix_nn(q, packed, offs, input_size):
    """Original module semantics: q (input_size,) -> (2, 2) diagonal matrix.

    Note: single-q latency is dominated by launch + the one-shot param DMA;
    prefer the batched entry points in hot loops."""
    d = damping_diagonals(q.reshape(1, -1), packed, offs, input_size)[0]
    return jnp.diag(d)   # diag built in the wrapper (exact zeros off-diagonal)


def damping_matrices_batched(Q, packed, offs, input_size):
    """Batched convenience: (B, input_size) -> (B, 2, 2) diagonal matrices."""
    d = damping_diagonals(Q, packed, offs, input_size)
    return jax.vmap(jnp.diag)(d)


def init_params(key, input_size, hidden_size):
    """nn.Linear-style init U(-1/sqrt(in), 1/sqrt(in)); weights stored (in, out)."""
    def linear(k, fan_in, fan_out):
        kw, kb = jax.random.split(k)
        bound = 1.0 / jnp.sqrt(jnp.float32(fan_in))
        w = jax.random.uniform(kw, (fan_in, fan_out), jnp.float32, -bound, bound)
        b = jax.random.uniform(kb, (fan_out,), jnp.float32, -bound, bound)
        return w, b

    k1, k2, k3 = jax.random.split(key, 3)
    w1, b1 = linear(k1, input_size, hidden_size)
    w2, b2 = linear(k2, hidden_size, hidden_size)
    w3, b3 = linear(k3, hidden_size, OUT_SIZE)
    return (w1, b1, w2, b2, w3, b3)


def _reference(Q, params):
    """Pure-JAX reference of the PyTorch network (returns diagonal entries)."""
    w1, b1, w2, b2, w3, b3 = params
    h1 = jax.nn.softplus(Q @ w1 + b1)
    h2 = jax.nn.softplus(h1 @ w2 + b2)
    return jax.nn.softplus(h2 @ w3 + b3) + EPSILON


if __name__ == "__main__":
    input_size = 2     # generalized coordinates q (2-DOF system -> 2x2 damping)
    hidden_size = 32
    batch = 64

    key = jax.random.PRNGKey(0)
    kq, kp, kb = jax.random.split(key, 3)
    params = init_params(kp, input_size, hidden_size)
    packed, offs = pack_params(params, input_size, hidden_size)

    # --- Single-q forward (original module semantics): (2,) -> (2, 2) diag ---
    q = jax.random.normal(kq, (input_size,), jnp.float32)
    out = jax.block_until_ready(damping_matrix_nn(q, packed, offs, input_size))
    ref = _reference(q.reshape(1, -1), params)[0]
    assert out.shape == (2, 2)
    assert jnp.allclose(jnp.diag(out), ref, atol=1e-5, rtol=1e-5), (out, ref)
    assert float(out[0, 1]) == 0.0 and float(out[1, 0]) == 0.0

    # --- Batched forward: (B, 2) -> (B, 2) diagonals / (B, 2, 2) matrices ---
    Q = jax.random.normal(kb, (batch, input_size), jnp.float32)
    d = jax.block_until_ready(damping_diagonals(Q, packed, offs, input_size))
    ref_d = _reference(Q, params)
    assert d.shape == (batch, OUT_SIZE)
    assert jnp.allclose(d, ref_d, atol=1e-5, rtol=1e-5)
    mats = jax.block_until_ready(
        damping_matrices_batched(Q, packed, offs, input_size))
    assert mats.shape == (batch, 2, 2)
    assert float(jnp.max(jnp.abs(mats[:, 0, 1]))) == 0.0
    assert float(jnp.max(jnp.abs(mats[:, 1, 0]))) == 0.0

    # --- Odd batch size exercises the tile-selection / padding path ---
    Q2 = jax.random.normal(kq, (37, input_size), jnp.float32)
    d2 = jax.block_until_ready(damping_diagonals(Q2, packed, offs, input_size))
    assert jnp.allclose(d2, _reference(Q2, params), atol=1e-5, rtol=1e-5)

    print("KERNEL_OK")
</pallas_src>

<mosaic_0001>
module attributes {stable_mosaic.version = 11 : i64} {
  func.func @kernel(%arg0: i32, %arg1: memref<8x2xf32, #tpu.memory_space<vmem>>, %arg2: memref<288x128xf32, #tpu.memory_space<vmem>>, %arg3: memref<8x2xf32, #tpu.memory_space<vmem>>) attributes {dimension_semantics = [#tpu.dimension_semantics<parallel>], iteration_bounds = array<i64: 1>, scalar_prefetch = 0 : i64, scratch_operands = 0 : i64, tpu.core_type = #tpu.core_type<tc>, window_params = [{transform_indices = @transform_0, window_bounds = array<i64: 8, 2>}, {pipeline_mode = #tpu.pipeline_mode<synchronous>, transform_indices = @transform_1, window_bounds = array<i64: 288, 128>}, {transform_indices = @transform_2, window_bounds = array<i64: 8, 2>}]} {
    %c0 = arith.constant 0 : index
    %c0_0 = arith.constant 0 : index
    %0 = vector.load %arg1[%c0, %c0_0] : memref<8x2xf32, #tpu.memory_space<vmem>>, vector<8x2xf32>
    %c8 = arith.constant 8 : index
    %c0_1 = arith.constant 0 : index
    %1 = vector.load %arg2[%c8, %c0_1] : memref<288x128xf32, #tpu.memory_space<vmem>>, vector<1x128xf32>
    %2 = vector.extract_strided_slice %0 {offsets = [0, 0], sizes = [8, 1], strides = [1, 1]} : vector<8x2xf32> to vector<8x1xf32>
    %c0_2 = arith.constant 0 : index
    %c0_3 = arith.constant 0 : index
    %3 = vector.load %arg2[%c0_2, %c0_3] : memref<288x128xf32, #tpu.memory_space<vmem>>, vector<1x128xf32>
    %4 = vector.broadcast %2 : vector<8x1xf32> to vector<8x128xf32>
    %5 = vector.broadcast %3 : vector<1x128xf32> to vector<8x128xf32>
    %6 = arith.mulf %4, %5 : vector<8x128xf32>
    %7 = vector.broadcast %1 : vector<1x128xf32> to vector<8x128xf32>
    %8 = arith.addf %7, %6 : vector<8x128xf32>
    %9 = vector.extract_strided_slice %0 {offsets = [0, 1], sizes = [8, 1], strides = [1, 1]} : vector<8x2xf32> to vector<8x1xf32>
    %c1 = arith.constant 1 : index
    %c0_4 = arith.constant 0 : index
    %10 = vector.load %arg2[%c1, %c0_4] : memref<288x128xf32, #tpu.memory_space<vmem>>, vector<1x128xf32>
    %11 = vector.broadcast %9 : vector<8x1xf32> to vector<8x128xf32>
    %12 = vector.broadcast %10 : vector<1x128xf32> to vector<8x128xf32>
    %13 = arith.mulf %11, %12 : vector<8x128xf32>
    %14 = arith.addf %8, %13 : vector<8x128xf32>
    %cst = arith.constant 2.000000e+01 : f32
    %15 = vector.broadcast %cst : f32 to vector<8x128xf32>
    %16 = arith.cmpf ogt, %14, %15 : vector<8x128xf32>
    %17 = math.exp %14 : vector<8x128xf32>
    %18 = math.log1p %17 : vector<8x128xf32>
    %19 = arith.select %16, %14, %18 : vector<8x128xi1>, vector<8x128xf32>
    %c16 = arith.constant 16 : index
    %c0_5 = arith.constant 0 : index
    %20 = vector.load %arg2[%c16, %c0_5] : memref<288x128xf32, #tpu.memory_space<vmem>>, vector<128x128xf32>
    %c144 = arith.constant 144 : index
    %c0_6 = arith.constant 0 : index
    %21 = vector.load %arg2[%c144, %c0_6] : memref<288x128xf32, #tpu.memory_space<vmem>>, vector<1x128xf32>
    %cst_7 = arith.constant dense<0.000000e+00> : vector<8x128xf32>
    %22 = tpu.matmul %19, %20, %cst_7 {dimension_numbers = #tpu.dot_dimension_numbers<[1], [0], [0], [1], [0, 0, 1, 1], [], []>} : vector<8x128xf32>, vector<128x128xf32>, vector<8x128xf32> -> vector<8x128xf32>
    %23 = vector.broadcast %21 : vector<1x128xf32> to vector<8x128xf32>
    %24 = arith.addf %22, %23 : vector<8x128xf32>
    %cst_8 = arith.constant 2.000000e+01 : f32
    %25 = vector.broadcast %cst_8 : f32 to vector<8x128xf32>
    %26 = arith.cmpf ogt, %24, %25 : vector<8x128xf32>
    %27 = math.exp %24 : vector<8x128xf32>
    %28 = math.log1p %27 : vector<8x128xf32>
    %29 = arith.select %26, %24, %28 : vector<8x128xi1>, vector<8x128xf32>
    %c152 = arith.constant 152 : index
    %c0_9 = arith.constant 0 : index
    %30 = vector.load %arg2[%c152, %c0_9] : memref<288x128xf32, #tpu.memory_space<vmem>>, vector<128x128xf32>
    %c280 = arith.constant 280 : index
    %c0_10 = arith.constant 0 : index
    %31 = vector.load %arg2[%c280, %c0_10] : memref<288x128xf32, #tpu.memory_space<vmem>>, vector<1x128xf32>
    %cst_11 = arith.constant dense<0.000000e+00> : vector<8x128xf32>
    %32 = tpu.matmul %29, %30, %cst_11 {dimension_numbers = #tpu.dot_dimension_numbers<[1], [0], [0], [1], [0, 0, 1, 1], [], []>} : vector<8x128xf32>, vector<128x128xf32>, vector<8x128xf32> -> vector<8x128xf32>
    %33 = vector.broadcast %31 : vector<1x128xf32> to vector<8x128xf32>
    %34 = arith.addf %32, %33 : vector<8x128xf32>
    %35 = vector.extract_strided_slice %34 {offsets = [0, 0], sizes = [8, 2], strides = [1, 1]} : vector<8x128xf32> to vector<8x2xf32>
    %c0_12 = arith.constant 0 : index
    %c0_13 = arith.constant 0 : index
    %36 = vector.load %arg3[%c0_12, %c0_13] : memref<8x2xf32, #tpu.memory_space<vmem>>, vector<8x2xf32>
    tpu.vector_store %arg3[%c0_12, %c0_13], %35 {strides = array<i32>} : memref<8x2xf32, #tpu.memory_space<vmem>>, vector<8x2xf32>,
    return
  }
  func.func @transform_0(%arg0: i32) -> (i32, i32) {
    %c0_i32 = arith.constant 0 : i32
    %c0_i32_0 = arith.constant 0 : i32
    return %arg0, %c0_i32 : i32, i32
  }
  func.func @transform_1(%arg0: i32) -> (i32, i32) {
    %c0_i32 = arith.constant 0 : i32
    %c0_i32_0 = arith.constant 0 : i32
    %c0_i32_1 = arith.constant 0 : i32
    return %c0_i32, %c0_i32_0 : i32, i32
  }
  func.func @transform_2(%arg0: i32) -> (i32, i32) {
    %c0_i32 = arith.constant 0 : i32
    %c0_i32_0 = arith.constant 0 : i32
    return %arg0, %c0_i32 : i32, i32
  }
}

</mosaic_0001>

<bundles_post_ra>
// kernel: tpu_custom_call.1
= control target key start
LH: loop header
LB: loop body
LE: loop exit
PB: predicated region body
PF: predicated region fallthrough
CT: control target
= control target key end

     0   :  { %7 = vsyncpa [#allocation3], 0  ;;  %s417_s9 = smov [#allocation2]   ;;  %s482_s0 = inlined_call_operand.vmem [shape: f32[8,2], index: 0, kind: input, shape index: {}]   ;;  %s483_s1 = inlined_call_operand.hbm [shape: f32[288,128], index: 1, kind: input, shape index: {}]   ;;  %s484_s2 = inlined_call_operand.vmem [shape: f32[8,2], index: 2, kind: output, shape index: {}]  }
   0x1   :  { %s15_s10 = sshll.u32 %s417_s9, 4  ;;  %s16_s10 = int_to_ptr.vmem [resolvable:$true] %s15_s10 }
   0x2   :  { %s403_s11 = scalar_lea.vmem %s16_s10, 4608  ;;  %p408_p1 = scmp.lt.s32.totalorder %s16_s10, %s16_s10 }
   0x3   :  { %p404_p0 = scmp.ne.s32.totalorder %s16_s10, %s403_s11  ;;  %p409_p2 = scmp.lt.s32.totalorder %s403_s11, %s403_s11 }
   0x5   :  { %p410_p3 = por %p409_p2, %p408_p1 }
   0x7   :  { %p411_p4 = pnand %p410_p3, %p404_p0 }
   0x9   :  { %414 = shalt.err (!%p411_p4)
}
   0xa   :  { %s418_s12 = smov 128   ;;  %s419_s13 = smov 8  }
   0xb   :  { %21 = dma.hbm_to_vmem [thread:$0]  %s483_s1, 4608, %s16_s10, [#allocation3], %s418_s12, %s418_s12, %s419_s13  }
   0xc   :  { %415 = dma.done.wait [#allocation3], 4608  }
   0xd   :  { %416 = vsyncadd [#allocation3], 4294962688  ;;  %v420_v0 = vmov 0   ;;  %v25_v1 = vld [vmem:[%s482_s0] sm:$0xff]  ;;  %v421_v2 = vmov 1   ;;  %v82_v3 = vld [vmem:[#allocation2 + $0x88] sm:$0xff] }
   0xe   :  { %385 = vset.pattern.permute.xlu0 %v420_v0  ;;  %v422_v4 = vmov 0.0   ;;  %v81_v5 = vld [vmem:[#allocation2 + $0x80] sm:$0xff]  ;;  %vm423_vm0 = vmmov 0   ;;  %v80_v6 = vld [vmem:[#allocation2 + $0x78] sm:$0xff]  ;;  %v79_v7 = vld [vmem:[#allocation2 + $0x70] sm:$0xff]  ;;  %vm262_vm5 = vcmask 15360  }
   0xf   :  { %30 = vperm.xlu0 %385, %v25_v1   ;;  %308 = vmatprep.subr.mxu0 %v422_v4  ;;  %v78_v8 = vld [vmem:[#allocation2 + $0x68] sm:$0xff]  ;;  %v77_v9 = vld [vmem:[#allocation2 + $0x60] sm:$0xff]  ;;  %v76_v10 = vld [vmem:[#allocation2 + $0x58] sm:$0xff] }
  0x10   :  { %340 = vmatprep.mubr.msk.f32.mxu0 %vm423_vm0, %v422_v4  ;;  %309 = vmatpush3.msra.mxu0 %v82_v3  ;;  %v75_v11 = vld [vmem:[#allocation2 + $0x50] sm:$0xff]  ;;  %v74_v12 = vld [vmem:[#allocation2 + $0x48] sm:$0xff]  ;;  %v73_v13 = vld [vmem:[#allocation2 + $0x40] sm:$0xff] }
  0x11   :  { %343 = vmatprep.subr.mxu1 %v422_v4  ;;  %310 = vmatprep.subr.mxu0 %v422_v4  ;;  %v72_v14 = vld [vmem:[#allocation2 + $0x38] sm:$0xff]  ;;  %v71_v15 = vld [vmem:[#allocation2 + $0x30] sm:$0xff]  ;;  %v70_v16 = vld [vmem:[#allocation2 + $0x28] sm:$0xff] }
  0x12   :  { %375 = vmatprep.mubr.msk.f32.mxu1 %vm423_vm0, %v422_v4  ;;  %311 = vmatpush3.msra.mxu0 %v81_v5  ;;  %v69_v17 = vld [vmem:[#allocation2 + $0x20] sm:$0xff]  ;;  %v68_v18 = vld [vmem:[#allocation2 + $0x18] sm:$0xff]  ;;  %v67_v19 = vld [vmem:[#allocation2 + $0x10] sm:$0xff] }
  0x13   :  { %386 = vset.pattern.permute.xlu0 %v421_v2  ;;  %312 = vmatprep.subr.mxu0 %v422_v4  ;;  %v269_v20 = vld [vmem:[#allocation2] ss:$0 sm:$0xff]  ;;  %v270_v23 = vld [vmem:[#allocation2 + $0x8] ss:$0 sm:$0xff]  ;;  %v271_v24 = vld [vmem:[#allocation2 + $0x1] ss:$0 sm:$0xff] }
  0x14   :  { %45 = vperm.xlu0 %386, %v25_v1   ;;  %313 = vmatpush3.msra.mxu0 %v80_v6  ;;  %v186_v40 = vld [vmem:[#allocation2 + $0x110] sm:$0xff]  ;;  %v185_v41 = vld [vmem:[#allocation2 + $0x108] sm:$0xff]  ;;  %v184_v42 = vld [vmem:[#allocation2 + $0x100] sm:$0xff] }
  0x15   :  { %314 = vmatprep.subr.mxu0 %v422_v4  ;;  %344 = vmatpush3.msra.mxu1 %v186_v40  ;;  %v183_v43 = vld [vmem:[#allocation2 + $0xf8] sm:$0xff]  ;;  %v182_v44 = vld [vmem:[#allocation2 + $0xf0] sm:$0xff]  ;;  %v181_v45 = vld [vmem:[#allocation2 + $0xe8] sm:$0xff] }
  0x16   :  { %315 = vmatpush3.msra.mxu0 %v79_v7  ;;  %345 = vmatprep.subr.mxu1 %v422_v4  ;;  %v180_v46 = vld [vmem:[#allocation2 + $0xe0] sm:$0xff]  ;;  %v179_v47 = vld [vmem:[#allocation2 + $0xd8] sm:$0xff]  ;;  %v178_v48 = vld [vmem:[#allocation2 + $0xd0] sm:$0xff] }
  0x17   :  { %316 = vmatprep.subr.mxu0 %v422_v4  ;;  %346 = vmatpush3.msra.mxu1 %v185_v41  ;;  %v177_v49 = vld [vmem:[#allocation2 + $0xc8] sm:$0xff]  ;;  %v176_v50 = vld [vmem:[#allocation2 + $0xc0] sm:$0xff]  ;;  %v175_v51 = vld [vmem:[#allocation2 + $0xb8] sm:$0xff] }
  0x18   :  { %317 = vmatpush3.msra.mxu0 %v78_v8  ;;  %347 = vmatprep.subr.mxu1 %v422_v4  ;;  %v174_v52 = vld [vmem:[#allocation2 + $0xb0] sm:$0xff]  ;;  %v173_v53 = vld [vmem:[#allocation2 + $0xa8] sm:$0xff]  ;;  %v172_v54 = vld [vmem:[#allocation2 + $0xa0] sm:$0xff] }
  0x19   :  { %318 = vmatprep.subr.mxu0 %v422_v4  ;;  %348 = vmatpush3.msra.mxu1 %v184_v42  ;;  %v171_v55 = vld [vmem:[#allocation2 + $0x98] sm:$0xff]  ;;  %v272_v56 = vld [vmem:[#allocation2 + $0x90] ss:$0 sm:$0xff] }
  0x1a   :  { %319 = vmatpush3.msra.mxu0 %v77_v9  ;;  %349 = vmatprep.subr.mxu1 %v422_v4  ;;  %v273_v7 = vld [vmem:[#allocation2 + $0x118] ss:$0 sm:$0xff] }
  0x1b   :  { %320 = vmatprep.subr.mxu0 %v422_v4  ;;  %350 = vmatpush3.msra.mxu1 %v183_v43 }
  0x1c   :  { %321 = vmatpush3.msra.mxu0 %v76_v10  ;;  %351 = vmatprep.subr.mxu1 %v422_v4 }
  0x1d   :  { %322 = vmatprep.subr.mxu0 %v422_v4  ;;  %352 = vmatpush3.msra.mxu1 %v182_v44 }
  0x1e   :  { %323 = vmatpush3.msra.mxu0 %v75_v11  ;;  %353 = vmatprep.subr.mxu1 %v422_v4 }
  0x1f   :  { %324 = vmatprep.subr.mxu0 %v422_v4  ;;  %354 = vmatpush3.msra.mxu1 %v181_v45 }
  0x20   :  { %325 = vmatpush3.msra.mxu0 %v74_v12  ;;  %355 = vmatprep.subr.mxu1 %v422_v4 }
  0x21   :  { %326 = vmatprep.subr.mxu0 %v422_v4  ;;  %356 = vmatpush3.msra.mxu1 %v180_v46 }
  0x22   :  { %327 = vmatpush3.msra.mxu0 %v73_v13  ;;  %357 = vmatprep.subr.mxu1 %v422_v4 }
  0x23   :  { %328 = vmatprep.subr.mxu0 %v422_v4  ;;  %358 = vmatpush3.msra.mxu1 %v179_v47 }
  0x24   :  { %329 = vmatpush3.msra.mxu0 %v72_v14  ;;  %359 = vmatprep.subr.mxu1 %v422_v4 }
  0x25   :  { %330 = vmatprep.subr.mxu0 %v422_v4  ;;  %360 = vmatpush3.msra.mxu1 %v178_v48 }
  0x26   :  { %331 = vmatpush3.msra.mxu0 %v71_v15  ;;  %361 = vmatprep.subr.mxu1 %v422_v4 }
  0x27   :  { %332 = vmatprep.subr.mxu0 %v422_v4  ;;  %362 = vmatpush3.msra.mxu1 %v177_v49 }
  0x28   :  { %333 = vmatpush3.msra.mxu0 %v70_v16  ;;  %363 = vmatprep.subr.mxu1 %v422_v4 }
  0x29   :  { %334 = vmatprep.subr.mxu0 %v422_v4  ;;  %364 = vmatpush3.msra.mxu1 %v176_v50 }
  0x2a   :  { %335 = vmatpush3.msra.mxu0 %v69_v17  ;;  %365 = vmatprep.subr.mxu1 %v422_v4 }
  0x2b   :  { %336 = vmatprep.subr.mxu0 %v422_v4  ;;  %366 = vmatpush3.msra.mxu1 %v175_v51 }
  0x2c   :  { %337 = vmatpush3.msra.mxu0 %v68_v18  ;;  %367 = vmatprep.subr.mxu1 %v422_v4 }
  0x2d   :  { %338 = vmatprep.subr.mxu0 %v422_v4  ;;  %368 = vmatpush3.msra.mxu1 %v174_v52 }
  0x2e   :  { %339 = vmatpush3.msra.mxu0 %v67_v19  ;;  %369 = vmatprep.subr.mxu1 %v422_v4 }
  0x2f   :  { %370 = vmatpush3.msra.mxu1 %v173_v53 }
  0x30   :  { %371 = vmatprep.subr.mxu1 %v422_v4 }
  0x31   :  { %372 = vmatpush3.msra.mxu1 %v172_v54 }
  0x32   :  { %373 = vmatprep.subr.mxu1 %v422_v4 }
  0x33   :  { %374 = vmatpush3.msra.mxu1 %v171_v55 }
  0x8a   :  { %v31_v21 = vpop.permute.xlu0 %30 }
  0x8b   :  { %v37_v22 = vmul.f32 %v269_v20, %v31_v21 }
  0x8d   :  { %v42_v26 = vadd.f32 %v270_v23, %v37_v22 }
  0x8f   :  { %v46_v25 = vpop.permute.xlu0 %45 }
  0x90   :  { %v52_v27 = vmul.f32 %v271_v24, %v46_v25 }
  0x92   :  { %v53_v28 = vadd.f32 %v52_v27, %v42_v26 }
  0x94   :  { %v55_v29 = vmul.f32 1.442695, %v53_v28  ;;  %vm54_vm2 = vcmp.gt.f32.partialorder %v53_v28, 20.0 }
  0x96   :  { %387 = vpow2.f32 %v55_v29 }
  0xa3   :  { %v388_v30 = vpop.eup %387 }
  0xa4   :  { %v57_v31 = vadd.f32 1.0, %v388_v30  ;;  %v60_v32 = vmul.f32 -0.5, %v388_v30  ;;  %v63_v34 = vand.u32 2147483647, %v388_v30 }
  0xa6   :  { %389 = vlog2.f32 %v57_v31  ;;  %v61_v33 = vadd.f32 1.0, %v60_v32  ;;  %vm64_vm1 = vcmp.lt.f32.partialorder %v63_v34, 0.0004427343 }
  0xa8   :  { %v62_v37 = vmul.f32 %v388_v30, %v61_v33 }
  0xb3   :  { %v390_v35 = vpop.eup %389 }
  0xb4   :  { %v59_v36 = vmul.f32 0.6931472, %v390_v35 }
  0xb6   :  { %v65_v38 = vsel %vm64_vm1, %v62_v37, %v59_v36 }
  0xb7   :  { %v66_v39 = vsel %vm54_vm2, %v53_v28, %v65_v38 }
  0xb8   :  { %341 = vmatmul.mubr.f32.vlgmr.msra.gmra.mxu0 %v66_v39 }
 0x178   :  { %v154_v57 = vpop.f32.mrf.mxu0 }
 0x179   :  { %v155_v58 = vadd.f32 %v272_v56, %v154_v57 }
 0x17a   :  { %v342_v59 = vpop.f32.mrf.mxu0 }
 0x17b   :  { %v159_v60 = vmul.f32 1.442695, %v155_v58  ;;  %vm158_vm4 = vcmp.gt.f32.partialorder %v155_v58, 20.0 }
 0x17d   :  { %391 = vpow2.f32 %v159_v60 }
 0x18a   :  { %v392_v61 = vpop.eup %391 }
 0x18b   :  { %v161_v62 = vadd.f32 1.0, %v392_v61  ;;  %v164_v63 = vmul.f32 -0.5, %v392_v61  ;;  %v167_v1 = vand.u32 2147483647, %v392_v61 }
 0x18d   :  { %393 = vlog2.f32 %v161_v62  ;;  %v165_v0 = vadd.f32 1.0, %v164_v63  ;;  %vm168_vm3 = vcmp.lt.f32.partialorder %v167_v1, 0.0004427343 }
 0x18f   :  { %v166_v5 = vmul.f32 %v392_v61, %v165_v0 }
 0x19a   :  { %v394_v2 = vpop.eup %393 }
 0x19b   :  { %v163_v3 = vmul.f32 0.6931472, %v394_v2 }
 0x19d   :  { %v169_v6 = vsel %vm168_vm3, %v166_v5, %v163_v3 }
 0x19e   :  { %v170_v4 = vsel %vm158_vm4, %v155_v58, %v169_v6 }
 0x19f   :  { %376 = vmatmul.mubr.f32.vlgmr.msra.gmra.mxu1 %v170_v4 }
 0x25f   :  { %v258_v8 = vpop.f32.mrf.mxu1 }
 0x260   :  { %v259_v9 = vadd.f32 %v273_v7, %v258_v8 }
 0x261   :  { %v377_v10 = vpop.f32.mrf.mxu1 }
 0x262   :  { %263 = vst.msk [vmem:[%s484_s2] sm:$0xff] %vm262_vm5, %v259_v9 }
 0x263   :  { %268 = vsyncpa [#allocation3], 1 }

</bundles_post_ra>
